<compile_context>
chip_gen: v7x
topology: tpu7x:2x2x1
jax: 0.10.0
libtpu: 0.0.40
codegen_flags: <defaults>
</compile_context>

<pallas_src>
import functools

import jax
import jax.numpy as jnp
from jax.experimental import pallas as pl
from jax.experimental.pallas import tpu as pltpu


# --------------------------------------------------------------------------
# Pallas kernel: one (batch, HW-tile) grid point of the vector quantizer.
#   inputs : x    (D, tm)   latent columns (lane-dense on the spatial axis)
#            E    (K, D)    codebook (resident across the grid)
#            ee   (K, 1)    precomputed ||e_k||^2 (resident)
#   outputs: q    (D, tm)   quantized latents (same layout as x)
#            idx  (1, tm)   int32 nearest-code index per column (lane-dense)
#            sse  (1, 1)    per-tile sum of squared error (q - x)
#            cnt  (1, K)    per-tile code-usage counts (lane row)
# --------------------------------------------------------------------------
def _vq_kernel(x_ref, e_ref, ee_ref, q_ref, idx_ref, sse_ref, cnt_ref,
               *, hw, tm, padded):
    xt = x_ref[...]                                 # (D, tm) f32
    E = e_ref[...]                                  # (K, D)  f32
    ee = ee_ref[...]                                # (K, 1)  f32
    K = e_ref.shape[0]

    # Validity mask for padded tail columns (static no-op when HW % tm == 0).
    if padded:
        lane = jax.lax.broadcasted_iota(jnp.int32, (1, tm), 1)
        validf = ((pl.program_id(1) * tm + lane) < hw).astype(jnp.float32)
    else:
        validf = jnp.ones((1, tm), dtype=jnp.float32)

    # Squared distances ||x_m - e_k||^2 with the same fp ordering as the
    # reference: (xx + ee) - 2 * (E . x).
    xx = jnp.sum(xt * xt, axis=0, keepdims=True)                    # (1, tm)
    xe = jnp.dot(E, xt, preferred_element_type=jnp.float32)         # (K, tm)
    dist = xx + ee - 2.0 * xe                                       # (K, tm)

    # argmin over codes (axis 0) with first-occurrence tie-break, like
    # torch.argmin.
    dmin = jnp.min(dist, axis=0, keepdims=True)                     # (1, tm)
    row = jax.lax.broadcasted_iota(jnp.int32, dist.shape, 0)        # (K, tm)
    cand = jnp.where(dist <= dmin, row, K)
    idx = jnp.min(cand, axis=0, keepdims=True)                      # (1, tm)
    enc = (row == idx).astype(jnp.float32)                          # (K, tm)

    # Quantized latents: q = E^T @ enc  (MXU, contraction over K).
    # TODO(synk): for large codebooks (K >~ 2048) tile K here with a running
    # (dmin, idx) instead of materializing the full (K, tm) distance block.
    qt = jax.lax.dot_general(E, enc, (((0,), (0,)), ((), ())),
                             preferred_element_type=jnp.float32)    # (D, tm)

    q_ref[...] = qt                     # lane-dense store
    idx_ref[...] = idx                  # lane-dense int32 store

    # Per-tile statistics (reduced across tiles in the wrapper).
    diff = qt - xt
    if padded:
        diff = diff * validf
    sse_ref[...] = jnp.sum(jnp.sum(diff * diff, axis=1, keepdims=True),
                           axis=0, keepdims=True)                   # (1, 1)

    # Mask-weighted code counts as a single lane row: (1, tm) @ (K, tm)^T.
    cnt_ref[...] = jax.lax.dot_general(validf, enc, (((1,), (1,)), ((), ())),
                                       preferred_element_type=jnp.float32)


# --------------------------------------------------------------------------
# VMEM-aware tile choice: prefer big lane tiles (amortize ~0.35 us/step) but
# keep the per-step working set (double-buffered IO + (K, tm) intermediates +
# resident codebook) under a budget that fits v7x's 64 MiB VMEM too.
# --------------------------------------------------------------------------
def _choose_tiling(hw, d, k, vmem_budget=24 * 1024 * 1024):
    hw128 = -(-hw // 128) * 128          # round HW up to a lane multiple
    tm = min(2048, hw128)

    def step_bytes(t):
        dbl_io = 2 * 4 * (2 * d * t + t + 1 + k)   # double-buffered x,q,idx,sse,cnt
        interm = 4 * 4 * k * t                     # dist / cand / enc working set
        resident = 4 * (k * d + k)                 # codebook + ||e||^2
        return dbl_io + interm + resident

    while tm > 128 and step_bytes(tm) > vmem_budget:
        tm //= 2
    hwp = -(-hw // tm) * tm              # pad HW up to a tile multiple
    return tm, hwp


# --------------------------------------------------------------------------
# Wrapper: mirrors VectorQuantizer.forward (inputs NCHW with C = embedding_dim)
# Returns (loss, quantized_nchw, perplexity, encodings) like the PyTorch module.
# --------------------------------------------------------------------------
def vector_quantizer_forward(inputs_nchw, embedding, commitment_cost):
    N, D, H, W = inputs_nchw.shape
    K, D_e = embedding.shape
    assert D == D_e, "channel dim must equal embedding_dim"
    HW = H * W
    M = N * HW

    tm, hwp = _choose_tiling(HW, D, K)
    G = hwp // tm
    padded = hwp != HW

    # Free reshape to (N, D, HW); pad the spatial axis only if needed.
    x3 = inputs_nchw.reshape(N, D, HW)
    if padded:
        x3 = jnp.pad(x3, ((0, 0), (0, 0), (0, hwp - HW)))

    # ||e_k||^2 once, outside the kernel (cheap VPU reduction).
    ee = jnp.sum(embedding * embedding, axis=1, keepdims=True)        # (K, 1)

    kernel = functools.partial(_vq_kernel, hw=HW, tm=tm, padded=padded)

    q3, idx3, sse_part, cnt_part = pl.pallas_call(
        kernel,
        out_shape=(
            jax.ShapeDtypeStruct((N, D, hwp), jnp.float32),   # quantized (N, D, HW)
            jax.ShapeDtypeStruct((N, 1, hwp), jnp.int32),     # code indices
            jax.ShapeDtypeStruct((N, G, 1, 1), jnp.float32),  # per-tile SSE
            jax.ShapeDtypeStruct((N, G, 1, K), jnp.float32),  # per-tile counts
        ),
        grid=(N, G),
        in_specs=[
            pl.BlockSpec((None, D, tm), lambda n, i: (n, 0, i)),   # x tile
            pl.BlockSpec((K, D), lambda n, i: (0, 0)),             # codebook
            pl.BlockSpec((K, 1), lambda n, i: (0, 0)),             # ||e||^2
        ],
        out_specs=(
            pl.BlockSpec((None, D, tm), lambda n, i: (n, 0, i)),
            pl.BlockSpec((None, 1, tm), lambda n, i: (n, 0, i)),
            pl.BlockSpec((None, None, 1, 1), lambda n, i: (n, i, 0, 0)),
            pl.BlockSpec((None, None, 1, K), lambda n, i: (n, i, 0, 0)),
        ),
        compiler_params=pltpu.CompilerParams(
            dimension_semantics=("parallel", "parallel"),
            vmem_limit_bytes=32 * 1024 * 1024,
        ),
    )(x3, embedding, ee)

    # Cross-tile reductions + scalar finalization (a handful of XLA scalar ops).
    sse = jnp.sum(sse_part)
    mse = sse / jnp.float32(M * D)
    # q_latent_loss and e_latent_loss have identical forward values.
    loss = (1.0 + commitment_cost) * mse

    counts = jnp.sum(cnt_part, axis=(0, 1, 2))                        # (K,)
    avg_probs = counts / jnp.float32(M)
    perplexity = jnp.exp(-jnp.sum(avg_probs * jnp.log(avg_probs + 1e-10)))

    # Straight-through: forward value of (x + (q - x).detach()) == q.
    quantized_nchw = q3[:, :, :HW].reshape(N, D, H, W)
    idx_flat = idx3[:, 0, :HW].reshape(M)                             # (n, h, w) order
    encodings = jax.nn.one_hot(idx_flat, K, dtype=jnp.float32)        # (M, K)
    return loss, quantized_nchw, perplexity, encodings


# --------------------------------------------------------------------------
# Pure-JAX reference (mirrors the PyTorch forward) for correctness checking.
# --------------------------------------------------------------------------
def _reference_vq(inputs_nchw, embedding, commitment_cost):
    x = jnp.transpose(inputs_nchw, (0, 2, 3, 1))
    K, D = embedding.shape
    flat = x.reshape(-1, D)
    dist = (jnp.sum(flat ** 2, axis=1, keepdims=True)
            + jnp.sum(embedding ** 2, axis=1)
            - 2.0 * flat @ embedding.T)
    idx = jnp.argmin(dist, axis=1)
    enc = jax.nn.one_hot(idx, K, dtype=jnp.float32)
    q = (enc @ embedding).reshape(x.shape)
    mse = jnp.mean((q - x) ** 2)
    loss = (1.0 + commitment_cost) * mse
    avg = jnp.mean(enc, axis=0)
    perp = jnp.exp(-jnp.sum(avg * jnp.log(avg + 1e-10)))
    return loss, jnp.transpose(q, (0, 3, 1, 2)), perp, enc


if __name__ == "__main__":
    key = jax.random.PRNGKey(0)
    k_emb, k_x = jax.random.split(key)

    # Small shapes consistent with the module: C (= embedding_dim) = 16,
    # batch 2, 16x16 latent grid, 64 codebook entries.
    N, D, H, W = 2, 16, 16, 16
    K = 64
    beta = 0.25

    embedding = jax.random.uniform(k_emb, (K, D), jnp.float32,
                                   minval=-1.0 / K, maxval=1.0 / K)
    x = jax.random.normal(k_x, (N, D, H, W), jnp.float32)

    fwd = jax.jit(functools.partial(vector_quantizer_forward,
                                    commitment_cost=beta))
    loss, quantized, perplexity, encodings = fwd(x, embedding)
    jax.block_until_ready((loss, quantized, perplexity, encodings))

    # Shape / finiteness checks against the module's contract.
    assert quantized.shape == (N, D, H, W)
    assert encodings.shape == (N * H * W, K)
    assert loss.shape == () and perplexity.shape == ()
    assert bool(jnp.isfinite(loss)) and bool(jnp.isfinite(perplexity))

    # Numerical check against a plain-JAX mirror of the PyTorch forward.
    r_loss, r_q, r_perp, r_enc = _reference_vq(x, embedding, beta)
    assert jnp.allclose(loss, r_loss, atol=1e-5, rtol=1e-5)
    assert jnp.allclose(perplexity, r_perp, atol=1e-5, rtol=1e-5)
    assert jnp.allclose(quantized, r_q, atol=1e-5, rtol=1e-5)
    assert jnp.array_equal(encodings, r_enc)

    print("KERNEL_OK")
</pallas_src>

<mosaic_0001>
module attributes {stable_mosaic.version = 11 : i64} {
  func.func @_vq_kernel(%arg0: i32, %arg1: i32, %arg2: memref<1x16x256xf32, #tpu.memory_space<vmem>>, %arg3: memref<64x16xf32, #tpu.memory_space<vmem>>, %arg4: memref<64x1xf32, #tpu.memory_space<vmem>>, %arg5: memref<1x16x256xf32, #tpu.memory_space<vmem>>, %arg6: memref<1x1x256xi32, #tpu.memory_space<vmem>>, %arg7: memref<1x1x1x1xf32, #tpu.memory_space<vmem>>, %arg8: memref<1x1x1x64xf32, #tpu.memory_space<vmem>>) attributes {dimension_semantics = [#tpu.dimension_semantics<parallel>, #tpu.dimension_semantics<parallel>], iteration_bounds = array<i64: 2, 1>, scalar_prefetch = 0 : i64, scratch_operands = 0 : i64, tpu.core_type = #tpu.core_type<tc>, window_params = [{transform_indices = @transform_0, window_bounds = array<i64: 1, 16, 256>}, {pipeline_mode = #tpu.pipeline_mode<synchronous>, transform_indices = @transform_1, window_bounds = array<i64: 64, 16>}, {pipeline_mode = #tpu.pipeline_mode<synchronous>, transform_indices = @transform_2, window_bounds = array<i64: 64, 1>}, {transform_indices = @transform_3, window_bounds = array<i64: 1, 16, 256>}, {transform_indices = @transform_4, window_bounds = array<i64: 1, 1, 256>}, {transform_indices = @transform_5, window_bounds = array<i64: 1, 1, 1, 1>}, {transform_indices = @transform_6, window_bounds = array<i64: 1, 1, 1, 64>}]} {
    %c0 = arith.constant 0 : index
    %c0_0 = arith.constant 0 : index
    %c0_1 = arith.constant 0 : index
    %0 = vector.load %arg2[%c0, %c0_0, %c0_1] : memref<1x16x256xf32, #tpu.memory_space<vmem>>, vector<1x16x256xf32>
    %1 = vector.shape_cast %0 : vector<1x16x256xf32> to vector<16x256xf32>
    %c0_2 = arith.constant 0 : index
    %c0_3 = arith.constant 0 : index
    %2 = vector.load %arg3[%c0_2, %c0_3] : memref<64x16xf32, #tpu.memory_space<vmem>>, vector<64x16xf32>
    %c0_4 = arith.constant 0 : index
    %c0_5 = arith.constant 0 : index
    %3 = vector.load %arg4[%c0_4, %c0_5] : memref<64x1xf32, #tpu.memory_space<vmem>>, vector<64x1xf32>
    %cst = arith.constant 1.000000e+00 : f32
    %4 = vector.broadcast %cst : f32 to vector<1x256xf32>
    %5 = arith.mulf %1, %1 : vector<16x256xf32>
    %cst_6 = arith.constant dense<0.000000e+00> : vector<256xf32>
    %6 = vector.multi_reduction <add>, %5, %cst_6 [0] : vector<16x256xf32> to vector<256xf32>
    %7 = vector.shape_cast %6 : vector<256xf32> to vector<1x256xf32>
    %cst_7 = arith.constant dense<0.000000e+00> : vector<64x256xf32>
    %8 = tpu.matmul %2, %1, %cst_7 {dimension_numbers = #tpu.dot_dimension_numbers<[1], [0], [0], [1], [0, 0, 1, 1], [], []>} : vector<64x16xf32>, vector<16x256xf32>, vector<64x256xf32> -> vector<64x256xf32>
    %9 = vector.broadcast %7 : vector<1x256xf32> to vector<64x256xf32>
    %10 = vector.broadcast %3 : vector<64x1xf32> to vector<64x256xf32>
    %11 = arith.addf %9, %10 : vector<64x256xf32>
    %cst_8 = arith.constant 2.000000e+00 : f32
    %12 = vector.broadcast %cst_8 : f32 to vector<64x256xf32>
    %13 = arith.mulf %12, %8 : vector<64x256xf32>
    %14 = arith.subf %11, %13 : vector<64x256xf32>
    %cst_9 = arith.constant dense<0x7F800000> : vector<256xf32>
    %15 = vector.multi_reduction <minimumf>, %14, %cst_9 [0] : vector<64x256xf32> to vector<256xf32>
    %16 = vector.shape_cast %15 : vector<256xf32> to vector<1x256xf32>
    %17 = tpu.iota {dimensions = array<i32: 0>} : vector<64x256xi32>
    %18 = vector.broadcast %16 : vector<1x256xf32> to vector<64x256xf32>
    %19 = arith.cmpf ole, %14, %18 : vector<64x256xf32>
    %c64_i32 = arith.constant 64 : i32
    %20 = vector.broadcast %c64_i32 : i32 to vector<64x256xi32>
    %21 = arith.select %19, %17, %20 : vector<64x256xi1>, vector<64x256xi32>
    %cst_10 = arith.constant dense<2147483647> : vector<256xi32>
    %22 = vector.multi_reduction <minsi>, %21, %cst_10 [0] : vector<64x256xi32> to vector<256xi32>
    %23 = vector.shape_cast %22 : vector<256xi32> to vector<1x256xi32>
    %24 = vector.broadcast %23 : vector<1x256xi32> to vector<64x256xi32>
    %25 = arith.cmpi eq, %17, %24 : vector<64x256xi32>
    %26 = arith.extui %25 : vector<64x256xi1> to vector<64x256xi32>
    %27 = arith.sitofp %26 : vector<64x256xi32> to vector<64x256xf32>
    %cst_11 = arith.constant dense<0.000000e+00> : vector<16x256xf32>
    %28 = tpu.matmul %2, %27, %cst_11 {dimension_numbers = #tpu.dot_dimension_numbers<[0], [0], [1], [1], [0, 1, 1, 1], [], []>} : vector<64x16xf32>, vector<64x256xf32>, vector<16x256xf32> -> vector<16x256xf32>
    %c0_12 = arith.constant 0 : index
    %c0_13 = arith.constant 0 : index
    %c0_14 = arith.constant 0 : index
    %29 = vector.load %arg5[%c0_12, %c0_13, %c0_14] : memref<1x16x256xf32, #tpu.memory_space<vmem>>, vector<1x16x256xf32>
    %30 = vector.shape_cast %29 : vector<1x16x256xf32> to vector<16x256xf32>
    %31 = vector.shape_cast %28 : vector<16x256xf32> to vector<1x16x256xf32>
    tpu.vector_store %arg5[%c0_12, %c0_13, %c0_14], %31 {strides = array<i32>} : memref<1x16x256xf32, #tpu.memory_space<vmem>>, vector<1x16x256xf32>,
    %c0_15 = arith.constant 0 : index
    %c0_16 = arith.constant 0 : index
    %c0_17 = arith.constant 0 : index
    %32 = vector.load %arg6[%c0_15, %c0_16, %c0_17] : memref<1x1x256xi32, #tpu.memory_space<vmem>>, vector<1x1x256xi32>
    %33 = vector.shape_cast %32 : vector<1x1x256xi32> to vector<1x256xi32>
    %34 = vector.shape_cast %23 : vector<1x256xi32> to vector<1x1x256xi32>
    tpu.vector_store %arg6[%c0_15, %c0_16, %c0_17], %34 {strides = array<i32>} : memref<1x1x256xi32, #tpu.memory_space<vmem>>, vector<1x1x256xi32>,
    %35 = arith.subf %28, %1 : vector<16x256xf32>
    %36 = arith.mulf %35, %35 : vector<16x256xf32>
    %cst_18 = arith.constant dense<0.000000e+00> : vector<16xf32>
    %37 = vector.multi_reduction <add>, %36, %cst_18 [1] : vector<16x256xf32> to vector<16xf32>
    %38 = vector.shape_cast %37 : vector<16xf32> to vector<16x1xf32>
    %cst_19 = arith.constant dense<0.000000e+00> : vector<1xf32>
    %39 = vector.multi_reduction <add>, %38, %cst_19 [0] : vector<16x1xf32> to vector<1xf32>
    %40 = vector.shape_cast %39 : vector<1xf32> to vector<1x1xf32>
    %c0_20 = arith.constant 0 : index
    %c0_21 = arith.constant 0 : index
    %c0_22 = arith.constant 0 : index
    %c0_23 = arith.constant 0 : index
    %41 = vector.load %arg7[%c0_20, %c0_21, %c0_22, %c0_23] : memref<1x1x1x1xf32, #tpu.memory_space<vmem>>, vector<1x1x1x1xf32>
    %42 = vector.shape_cast %41 : vector<1x1x1x1xf32> to vector<1x1xf32>
    %43 = vector.shape_cast %40 : vector<1x1xf32> to vector<1x1x1x1xf32>
    tpu.vector_store %arg7[%c0_20, %c0_21, %c0_22, %c0_23], %43 {strides = array<i32>} : memref<1x1x1x1xf32, #tpu.memory_space<vmem>>, vector<1x1x1x1xf32>,
    %cst_24 = arith.constant dense<0.000000e+00> : vector<1x64xf32>
    %44 = tpu.matmul %4, %27, %cst_24 {dimension_numbers = #tpu.dot_dimension_numbers<[1], [1], [0], [0], [0, 0, 1, 0], [], []>} : vector<1x256xf32>, vector<64x256xf32>, vector<1x64xf32> -> vector<1x64xf32>
    %c0_25 = arith.constant 0 : index
    %c0_26 = arith.constant 0 : index
    %c0_27 = arith.constant 0 : index
    %c0_28 = arith.constant 0 : index
    %45 = vector.load %arg8[%c0_25, %c0_26, %c0_27, %c0_28] : memref<1x1x1x64xf32, #tpu.memory_space<vmem>>, vector<1x1x1x64xf32>
    %46 = vector.shape_cast %45 : vector<1x1x1x64xf32> to vector<1x64xf32>
    %47 = vector.shape_cast %44 : vector<1x64xf32> to vector<1x1x1x64xf32>
    tpu.vector_store %arg8[%c0_25, %c0_26, %c0_27, %c0_28], %47 {strides = array<i32>} : memref<1x1x1x64xf32, #tpu.memory_space<vmem>>, vector<1x1x1x64xf32>,
    return
  }
  func.func @transform_0(%arg0: i32, %arg1: i32) -> (i32, i32, i32) {
    %c0_i32 = arith.constant 0 : i32
    %c0_i32_0 = arith.constant 0 : i32
    return %arg0, %c0_i32, %arg1 : i32, i32, i32
  }
  func.func @transform_1(%arg0: i32, %arg1: i32) -> (i32, i32) {
    %c0_i32 = arith.constant 0 : i32
    %c0_i32_0 = arith.constant 0 : i32
    %c0_i32_1 = arith.constant 0 : i32
    return %c0_i32, %c0_i32_0 : i32, i32
  }
  func.func @transform_2(%arg0: i32, %arg1: i32) -> (i32, i32) {
    %c0_i32 = arith.constant 0 : i32
    %c0_i32_0 = arith.constant 0 : i32
    %c0_i32_1 = arith.constant 0 : i32
    return %c0_i32, %c0_i32_0 : i32, i32
  }
  func.func @transform_3(%arg0: i32, %arg1: i32) -> (i32, i32, i32) {
    %c0_i32 = arith.constant 0 : i32
    %c0_i32_0 = arith.constant 0 : i32
    return %arg0, %c0_i32, %arg1 : i32, i32, i32
  }
  func.func @transform_4(%arg0: i32, %arg1: i32) -> (i32, i32, i32) {
    %c0_i32 = arith.constant 0 : i32
    %c0_i32_0 = arith.constant 0 : i32
    return %arg0, %c0_i32, %arg1 : i32, i32, i32
  }
  func.func @transform_5(%arg0: i32, %arg1: i32) -> (i32, i32, i32, i32) {
    %c0_i32 = arith.constant 0 : i32
    %c0_i32_0 = arith.constant 0 : i32
    %c0_i32_1 = arith.constant 0 : i32
    return %arg0, %arg1, %c0_i32, %c0_i32_0 : i32, i32, i32, i32
  }
  func.func @transform_6(%arg0: i32, %arg1: i32) -> (i32, i32, i32, i32) {
    %c0_i32 = arith.constant 0 : i32
    %c0_i32_0 = arith.constant 0 : i32
    %c0_i32_1 = arith.constant 0 : i32
    return %arg0, %arg1, %c0_i32, %c0_i32_0 : i32, i32, i32, i32
  }
}

</mosaic_0001>

<bundles_post_ra>
// kernel: vector_quantizer_forward.1
= control target key start
LH: loop header
LB: loop body
LE: loop exit
PB: predicated region body
PF: predicated region fallthrough
CT: control target
= control target key end

     0   :  { %s1409_s21 = smov 0   ;;  %s1411_s22 = smov 0   ;;  %s1699_s0 = inlined_call_operand.vmem [shape: f32[2,16,256], index: 0, kind: input, shape index: {}]   ;;  %s1700_s1 = inlined_call_operand.vmem [shape: f32[64,16], index: 1, kind: input, shape index: {}]   ;;  %s1701_s2 = inlined_call_operand.vmem [shape: f32[64,1], index: 2, kind: input, shape index: {}]   ;;  %s1702_s3 = inlined_call_operand.vmem [shape: f32[2,16,256], index: 3, kind: output, shape index: {0}]   ;;  %s1703_s4 = inlined_call_operand.vmem [shape: s32[2,1,256], index: 4, kind: output, shape index: {1}]   ;;  %s1704_s5 = inlined_call_operand.vmem [shape: f32[2,1,1,1], index: 5, kind: output, shape index: {2}]   ;;  %s1705_s6 = inlined_call_operand.vmem [shape: f32[2,1,1,64], index: 6, kind: output, shape index: {3}]  }
   0x1   :  { %s1413_s23 = smov 0  }
   0x2 LB: > { %s29_s24 = sadd.s32 1, %s1363_s22  ;;  %p1210_p0 = scmp.ge.s32.totalorder %s1367_s23, 1  ;;  %s1367_s23 = sphi %s1413_s23, %s17_s23   ;;  %s1363_s22 = sphi %s1411_s22, %s1707_s22   ;;  %s1359_s21 = sphi %s1409_s21, %s1706_s21  }
   0x3   : > { %p31_p1 = scmp.ge.s32.totalorder %s29_s24, 2  ;;  %p246_p2 = scmp.lt.s32.totalorder %s1367_s23, 3 }
   0x5   : > { %s1709_s24 = smov (%p31_p1, %s29_s24), 0  ;;  %p247_p3 = pnand %p1210_p0, %p246_p2 }
   0x6   : > { %p305_p4 = scmp.lt.s32.totalorder (!%p247_p3), %s1359_s21, 1  ;;  %v1369_v0 = vmov (!%p247_p3), 0.0   ;;  %v1370_v1 = vmov (!%p247_p3), 0   ;;  %v357_v2 = vld [vmem:[%s1701_s2] sm:$0xff] (!%p247_p3)  ;;  %v359_v3 = vld [vmem:[%s1701_s2 + $0x10] sm:$0xff] (!%p247_p3)  ;;  %v358_v4 = vld [vmem:[%s1701_s2 + $0x8] sm:$0xff] (!%p247_p3) }
   0x7   : > { %250 = sbr.rel (%p247_p3) target bundleno = 712 (0x2c8), region = 32  ;;  %472 = vmatprep.mubr.f32.mxu0 (!%p247_p3), %v1369_v0  ;;  %873 = vmatprep.mubr.f32.mxu1 (!%p247_p3), %v1369_v0  ;;  %v360_v5 = vld [vmem:[%s1701_s2 + $0x18] sm:$0xff] (!%p247_p3)  ;;  %v361_v12 = vld [vmem:[%s1701_s2 + $0x20] sm:$0xff] (!%p247_p3)  ;;  %v362_v13 = vld [vmem:[%s1701_s2 + $0x28] sm:$0xff] (!%p247_p3)  ;;  %vm383_vm0 = vcmask (!%p247_p3), 130048   ;;  %v1371_v30 = vmov (!%p247_p3), 1.0  }
   0x8   : > { %1343 = vset.pattern.permute.xlu0 (!%p247_p3), %v1370_v1  ;;  %1344 = vset.pattern.permute.xlu1 (!%p247_p3), %v1370_v1  ;;  %v349_v14 = vld [vmem:[%s1700_s1] sm:$0xff] (!%p247_p3)  ;;  %v363_v15 = vld [vmem:[%s1701_s2 + $0x30] sm:$0xff] (!%p247_p3)  ;;  %v364_v16 = vld [vmem:[%s1701_s2 + $0x38] sm:$0xff] (!%p247_p3) }
   0x9   : > { %523 = vperm.xlu0 (!%p247_p3), %1343, %v357_v2   ;;  %533 = vperm.xlu1 (!%p247_p3), %1344, %v359_v3   ;;  %v350_v17 = vld [vmem:[%s1700_s1 + $0x8] sm:$0xff] (!%p247_p3)  ;;  %v351_v18 = vld [vmem:[%s1700_s1 + $0x10] sm:$0xff] (!%p247_p3)  ;;  %v352_v19 = vld [vmem:[%s1700_s1 + $0x18] sm:$0xff] (!%p247_p3) }
   0xa   : > { %v353_v20 = vld [vmem:[%s1700_s1 + $0x20] sm:$0xff] (!%p247_p3)  ;;  %v354_v21 = vld [vmem:[%s1700_s1 + $0x28] sm:$0xff] (!%p247_p3)  ;;  %v355_v22 = vld [vmem:[%s1700_s1 + $0x30] sm:$0xff] (!%p247_p3) }
   0xb   : > { %v356_v23 = vld [vmem:[%s1700_s1 + $0x38] sm:$0xff] (!%p247_p3) }
   0xd   : > { %528 = vperm.xlu0 (!%p247_p3), %1343, %v358_v4   ;;  %538 = vperm.xlu1 (!%p247_p3), %1344, %v360_v5  }
   0xe   : > { %s1711_s21 = smov (!%p305_p4, %s1359_s21), 1 }
   0xf   : > { %s1276_s29 = sshll.u32 %s1711_s21, 5  ;;  %s1215_s18 = sshll.u32 %s1711_s21, 1 }
  0x10   : > { %s312_s10 = scalar_lea.vmem %s1699_s0, %s1276_s29  ;;  %s331_s25 = scalar_lea.vmem %s1703_s4, %s1215_s18 }
  0x11   : > { %v1449_v6 = vld [vmem:[%s312_s10 + $0x8] sm:$0xff]  ;;  %v1451_v7 = vld [vmem:[%s312_s10 + $0x18] sm:$0xff]  ;;  %v1453_v8 = vld [vmem:[%s312_s10] sm:$0xff]  ;;  %543 = vperm.xlu0 %1343, %v361_v12   ;;  %548 = vperm.xlu1 %1344, %v362_v13   ;;  %s322_s28 = scalar_lea.vmem %s1702_s3, %s1276_s29  ;;  %s344_s7 = scalar_lea.vmem %s1705_s6, %s1711_s21 }
  0x12   : > { %v1278_v9 = vpack.c.bf16 %v1451_v7, %v1449_v6  ;;  %v1457_v10 = vld [vmem:[%s312_s10 + $0x10] sm:$0xff]  ;;  %v365_v24 = vmul.f32 %v1453_v8, %v1453_v8  ;;  %v366_v26 = vmul.f32 %v1449_v6, %v1449_v6  ;;  %v368_v27 = vmul.f32 %v1451_v7, %v1451_v7  ;;  %s338_s10 = scalar_lea.vmem %s1704_s5, %s1711_s21 }
  0x13   : > { %v1280_v11 = vpack.c.bf16 %v1457_v10, %v1453_v8  ;;  %v367_v25 = vmul.f32 %v1457_v10, %v1457_v10 }
  0x14   : > { %1279 = vmatprep.subr.bf16.mxu0 %v1278_v9  ;;  %v376_v29 = vadd.f32 %v368_v27, %v366_v26 }
  0x15   : > { %1281 = vmatpush1.bf16.msra.mxu0 %v1280_v11  ;;  %553 = vperm.xlu0 %1343, %v363_v15   ;;  %v369_v28 = vadd.f32 %v367_v25, %v365_v24 }
  0x16   : > { %558 = vperm.xlu1 %1344, %v364_v16   ;;  %v377_v32 = vrot.slane %v376_v29, 4 }
  0x17   : > { %v370_v31 = vrot.slane %v369_v28, 4 }
  0x18   : > { %1216 = vmatmul.mubr.msk.f32.vlgmr.msra.gmra.mrb[0].mxu0 %vm383_vm0, %v349_v14  ;;  %v378_v34 = vadd.f32 %v377_v32, %v376_v29 }
  0x19   : > { %478 = vmatprep.mubr.f32.mxu0 %v1369_v0  ;;  %v371_v33 = vadd.f32 %v370_v31, %v369_v28 }
  0x1a   : > { %v379_v36 = vrot.slane %v378_v34, 2 }
  0x1b   : > { %v372_v35 = vrot.slane %v371_v33, 2 }
  0x1c   : > { %1217 = vmatmul.mubr.msk.f32.gmra.mrb[2].mxu0 %vm383_vm0, %v350_v17  ;;  %v380_v38 = vadd.f32 %v379_v36, %v378_v34 }
  0x1d   : > { %484 = vmatprep.mubr.f32.mxu0 %v1369_v0  ;;  %v373_v37 = vadd.f32 %v372_v35, %v371_v33 }
  0x1e   : > { %v381_v40 = vrot.slane %v380_v38, 1 }
  0x1f   : > { %v374_v39 = vrot.slane %v373_v37, 1 }
  0x20   : > { %1218 = vmatmul.mubr.msk.f32.gmra.mrb[4].mxu0 %vm383_vm0, %v351_v18  ;;  %v1523_v45 = vadd.f32 %v381_v40, %v380_v38 }
  0x21   : > { %490 = vmatprep.mubr.f32.mxu0 %v1369_v0  ;;  %v1521_v44 = vadd.f32 %v374_v39, %v373_v37 }
  0x24   : > { %1219 = vmatmul.mubr.msk.f32.gmra.mrb[6].mxu0 %vm383_vm0, %v352_v19 }
  0x25   : > { %496 = vmatprep.mubr.f32.mxu0 %v1369_v0 }
  0x28   : > { %1220 = vmatmul.mubr.msk.f32.gmra.mrb[8].mxu0 %vm383_vm0, %v353_v20 }
  0x29   : > { %502 = vmatprep.mubr.f32.mxu0 %v1369_v0 }
  0x2c   : > { %1221 = vmatmul.mubr.msk.f32.gmra.mrb[10].mxu0 %vm383_vm0, %v354_v21 }
  0x2d   : > { %508 = vmatprep.mubr.f32.mxu0 %v1369_v0 }
  0x30   : > { %1222 = vmatmul.mubr.msk.f32.gmra.mrb[12].mxu0 %vm383_vm0, %v355_v22 }
  0x31   : > { %514 = vmatprep.mubr.f32.mxu0 %v1369_v0 }
  0x33   : > { %770 = vxpose.xlu0.b32.start [1/8] (short) (narrow) %v349_v14, 16 }
  0x34   : > { %1223 = vmatmul.mubr.msk.f32.gmra.mrb[14].mxu0 %vm383_vm0, %v356_v23 }
  0x35   : > { %997 = vmatprep.mubr.f32.mxu0 %v1371_v30 }
  0x37   : > { %771 = vxpose.xlu0.b32.cont [2/8] (short) (narrow) %v350_v17, 16 }
  0x3b   : > { %772 = vxpose.xlu0.b32.cont [3/8] (short) (narrow) %v351_v18, 16 }
  0x3f   : > { %773 = vxpose.xlu0.b32.cont [4/8] (short) (narrow) %v352_v19, 16 }
  0x43   : > { %774 = vxpose.xlu0.b32.cont [5/8] (short) (narrow) %v353_v20, 16 }
  0x47   : > { %775 = vxpose.xlu0.b32.cont [6/8] (short) (narrow) %v354_v21, 16 }
  0x4b   : > { %776 = vxpose.xlu0.b32.cont [7/8] (short) (narrow) %v355_v22, 16 }
  0x4f   : > { %777 = vxpose.xlu0.b32.end [8/8] (short) (narrow) %v356_v23, 16 }
  0x88   : > { %v524_v42 = vpop.permute.xlu0 %523  ;;  %v534_v47 = vpop.permute.xlu1 %533 }
  0x89   : > { %v561_v49 = vadd.f32 %v524_v42, %v1521_v44  ;;  %v565_v52 = vadd.f32 %v534_v47, %v1521_v44  ;;  %v562_v53 = vadd.f32 %v524_v42, %v1523_v45  ;;  %v566_v55 = vadd.f32 %v534_v47, %v1523_v45 }
  0x8c   : > { %v529_v51 = vpop.permute.xlu0 %528  ;;  %v539_v61 = vpop.permute.xlu1 %538 }
  0x8d   : > { %v563_v59 = vadd.f32 %v529_v51, %v1521_v44  ;;  %v564_v60 = vadd.f32 %v529_v51, %v1523_v45  ;;  %v567_v3 = vadd.f32 %v539_v61, %v1521_v44  ;;  %v568_v9 = vadd.f32 %v539_v61, %v1523_v45 }
  0x90   : > { %v544_v17 = vpop.permute.xlu0 %543  ;;  %v549_v33 = vpop.permute.xlu1 %548 }
  0x91   : > { %v569_v21 = vadd.f32 %v544_v17, %v1521_v44  ;;  %v570_v23 = vadd.f32 %v544_v17, %v1523_v45  ;;  %v571_v36 = vadd.f32 %v549_v33, %v1521_v44  ;;  %v572_v40 = vadd.f32 %v549_v33, %v1523_v45 }
  0xeb   : > { %v474_v41 = vpop.f32.mrb[0].mxu0 }
  0xec   : > { %v476_v43 = vpop.f32.mrb[1].mxu0  ;;  %v577_v50 = vmul.f32 2.0, %v474_v41  ;;  %v554_v41 = vpop.permute.xlu0 %553 }
  0xed   : > { %v578_v54 = vmul.f32 2.0, %v476_v43 }
  0xee   : > { %v1531_v63 = vsub.f32 %v561_v49, %v577_v50  ;;  %v573_v49 = vadd.f32 %v554_v41, %v1521_v44 }
  0xef   : > { %v480_v46 = vpop.f32.mrb[2].mxu0  ;;  %v1536_v4 = vsub.f32 %v562_v53, %v578_v54  ;;  %v559_v53 = vpop.permute.xlu1 %558  ;;  %v574_v54 = vadd.f32 %v554_v41, %v1523_v45 }
  0xf0   : > { %v482_v48 = vpop.f32.mrb[3].mxu0  ;;  %v579_v1 = vmul.f32 2.0, %v480_v46 }
  0xf1   : > { %v580_v5 = vmul.f32 2.0, %v482_v48 }
  0xf2   : > { %v1545_v19 = vsub.f32 %v563_v59, %v579_v1 }
  0xf3   : > { %v486_v56 = vpop.f32.mrb[4].mxu0  ;;  %v1550_v22 = vsub.f32 %v564_v60, %v580_v5  ;;  %v575_v60 = vadd.f32 %v559_v53, %v1521_v44 }
  0xf4   : > { %v581_v57 = vmul.f32 2.0, %v486_v56  ;;  %v488_v58 = vpop.f32.mrb[5].mxu0 }
  0xf5   : > { %v582_v62 = vmul.f32 2.0, %v488_v58 }
  0xf6   : > { %v1533_v2 = vsub.f32 %v565_v52, %v581_v57 }
  0xf7   : > { %v1539_v11 = vsub.f32 %v566_v55, %v582_v62  ;;  %v492_v12 = vpop.f32.mrb[6].mxu0 }
  0xf8   : > { %v609_v13 = vmin.f32 %v1531_v63, %v1533_v2  ;;  %v583_v14 = vmul.f32 2.0, %v492_v12  ;;  %v494_v15 = vpop.f32.mrb[7].mxu0 }
  0xf9   : > { %v622_v16 = vmin.f32 %v1536_v4, %v1539_v11  ;;  %v584_v18 = vmul.f32 2.0, %v494_v15 }
  0xfa   : > { %v1547_v20 = vsub.f32 %v567_v3, %v583_v14  ;;  %v576_v3 = vadd.f32 %v559_v53, %v1523_v45 }
  0xfb   : > { %v1553_v24 = vsub.f32 %v568_v9, %v584_v18  ;;  %v498_v25 = vpop.f32.mrb[8].mxu0 }
  0xfc   : > { %v610_v26 = vmin.f32 %v1545_v19, %v1547_v20  ;;  %v585_v27 = vmul.f32 2.0, %v498_v25  ;;  %v500_v28 = vpop.f32.mrb[9].mxu0 }
  0xfd   : > { %v623_v29 = vmin.f32 %v1550_v22, %v1553_v24  ;;  %v586_v31 = vmul.f32 2.0, %v500_v28 }
  0xfe   : > { %v1559_v32 = vsub.f32 %v569_v21, %v585_v27  ;;  %v635_v21 = vlaneseq }
  0xff   : > { %v1561_v34 = vsub.f32 %v570_v23, %v586_v31  ;;  %v504_v35 = vpop.f32.mrb[10].mxu0 }
 0x100   : > { %v611_v37 = vmin.f32 %v609_v13, %v1559_v32  ;;  %v587_v38 = vmul.f32 2.0, %v504_v35  ;;  %v506_v39 = vpop.f32.mrb[11].mxu0  ;;  %v1581_v27 = vshrl.u32 %v635_v21, 7 }
 0x101   : > { %v624_v42 = vmin.f32 %v622_v16, %v1561_v34  ;;  %v588_v43 = vmul.f32 2.0, %v506_v39 }
 0x102   : > { %v603_v46 = vsub.f32 %v571_v36, %v587_v38  ;;  %v1584_v33 = vadd.s32 8, %v1581_v27  ;;  %v1590_v38 = vadd.s32 24, %v1581_v27  ;;  %v1593_v39 = vadd.s32 32, %v1581_v27 }
 0x103   : > { %v1567_v47 = vsub.f32 %v572_v40, %v588_v43  ;;  %v510_v48 = vpop.f32.mrb[12].mxu0  ;;  %v1596_v40 = vadd.s32 40, %v1581_v27  ;;  %v1599_v41 = vadd.s32 48, %v1581_v27 }
 0x104   : > { %v612_v50 = vmin.f32 %v610_v26, %v603_v46  ;;  %v589_v51 = vmul.f32 2.0, %v510_v48  ;;  %v512_v52 = vpop.f32.mrb[13].mxu0 }
 0x105   : > { %v625_v55 = vmin.f32 %v623_v29, %v1567_v47  ;;  %v590_v56 = vmul.f32 2.0, %v512_v52 }
 0x106   : > { %v605_v57 = vsub.f32 %v573_v49, %v589_v51 }
 0x107   : > { %v1572_v58 = vsub.f32 %v574_v54, %v590_v56  ;;  %v516_v59 = vpop.f32.mrb[14].mxu0 }
 0x108   : > { %v613_v61 = vmin.f32 %v611_v37, %v605_v57  ;;  %v591_v62 = vmul.f32 2.0, %v516_v59  ;;  %v518_v1 = vpop.f32.mrb[15].mxu0  ;;  %v1587_v37 = vadd.s32 16, %v1581_v27 }
 0x109   : > { %v626_v5 = vmin.f32 %v624_v42, %v1572_v58  ;;  %v592_v9 = vmul.f32 2.0, %v518_v1  ;;  %v1602_v42 = vadd.s32 56, %v1581_v27 }
 0x10a   : > { %v607_v12 = vsub.f32 %v575_v60, %v591_v62 }
 0x10b   : > { %v1577_v13 = vsub.f32 %v576_v3, %v592_v9 }
 0x10c   : > { %v614_v14 = vmin.f32 %v612_v50, %v607_v12 }
 0x10d   : > { %v627_v15 = vmin.f32 %v625_v55, %v1577_v13 }
 0x10e   : > { %v615_v16 = vmin.f32 %v613_v61, %v614_v14 }
 0x10f   : > { %v628_v17 = vmin.f32 %v626_v5, %v627_v15 }
 0x110   : > { %v616_v18 = vrot.slane %v615_v16, 4 }
 0x111   : > { %v629_v23 = vrot.slane %v628_v17, 4 }
 0x112   : > { %v617_v44 = vmin.f32 %v615_v16, %v616_v18  ;;  %v1372_v18 = vmov 1966171168  }
 0x113   : > { %v630_v25 = vmin.f32 %v628_v17, %v629_v23  ;;  %v892_v23 = vunpack.c.l.s4 %v1372_v18 }
 0x114   : > { %v618_v26 = vrot.slane %v617_v44, 2 }
 0x115   : > { %v631_v45 = vrot.slane %v630_v25, 2 }
 0x116   : > { %v619_v28 = vmin.f32 %v617_v44, %v618_v26 }
 0x117   : > { %v632_v29 = vmin.f32 %v630_v25, %v631_v45  ;;  %v893_v25 = vunpack.c.0.s8 %v892_v23 }
 0x118   : > { %v620_v31 = vrot.slane %v619_v28, 1 }
 0x119   : > { %v633_v35 = vrot.slane %v632_v29, 1 }
 0x11a   : > { %v621_v36 = vmin.f32 %v619_v28, %v620_v31 }
 0x11b   : > { %v634_v43 = vmin.f32 %v632_v29, %v633_v35  ;;  %v896_v29 = vsub.s32 %v893_v25, %v1581_v27 }
 0x11c   : > { %vm644_vm1 = vcmp.le.f32.partialorder %v1531_v63, %v621_v36  ;;  %vm646_vm2 = vcmp.le.f32.partialorder %v1545_v19, %v621_v36  ;;  %vm648_vm3 = vcmp.le.f32.partialorder %v1533_v2, %v621_v36  ;;  %vm650_vm4 = vcmp.le.f32.partialorder %v1547_v20, %v621_v36 }
 0x11d   : > { %vm652_vm5 = vcmp.le.f32.partialorder %v1559_v32, %v621_v36  ;;  %vm654_vm6 = vcmp.le.f32.partialorder %v603_v46, %v621_v36  ;;  %vm656_vm7 = vcmp.le.f32.partialorder %v605_v57, %v621_v36  ;;  %vm658_vm8 = vcmp.le.f32.partialorder %v607_v12, %v621_v36 }
 0x11e   : > { %v660_v48 = vsel %vm644_vm1, %v1581_v27, 64  ;;  %v662_v49 = vsel %vm646_vm2, %v1584_v33, 64  ;;  %v664_v50 = vsel %vm648_vm3, %v1587_v37, 64  ;;  %v666_v51 = vsel %vm650_vm4, %v1590_v38, 64 }
 0x11f   : > { %v668_v63 = vsel %vm652_vm5, %v1593_v39, 64  ;;  %v670_v19 = vsel %vm654_vm6, %v1596_v40, 64  ;;  %v672_v2 = vsel %vm656_vm7, %v1599_v41, 64  ;;  %v674_v20 = vsel %vm658_vm8, %v1602_v42, 64 }
 0x120   : > { %vm676_vm9 = vcmp.lt.s32.totalorder %v660_v48, %v664_v50  ;;  %vm678_vm10 = vcmp.lt.s32.totalorder %v662_v49, %v666_v51  ;;  %vm645_vm11 = vcmp.le.f32.partialorder %v1536_v4, %v634_v43  ;;  %vm647_vm12 = vcmp.le.f32.partialorder %v1550_v22, %v634_v43 }
 0x121   : > { %v677_v32 = vsel %vm676_vm9, %v660_v48, %v664_v50  ;;  %v679_v46 = vsel %vm678_vm10, %v662_v49, %v666_v51  ;;  %vm649_vm13 = vcmp.le.f32.partialorder %v1539_v11, %v634_v43  ;;  %vm651_vm14 = vcmp.le.f32.partialorder %v1553_v24, %v634_v43 }
 0x122   : > { %vm680_vm15 = vcmp.lt.s32.totalorder %v677_v32, %v668_v63  ;;  %vm682_vm0 = vcmp.lt.s32.totalorder %v679_v46, %v670_v19  ;;  %vm653_vm1 = vcmp.le.f32.partialorder %v1561_v34, %v634_v43  ;;  %vm655_vm2 = vcmp.le.f32.partialorder %v1567_v47, %v634_v43 }
 0x123   : > { %v681_v52 = vsel %vm680_vm15, %v677_v32, %v668_v63  ;;  %v683_v53 = vsel %vm682_vm0, %v679_v46, %v670_v19  ;;  %vm657_vm3 = vcmp.le.f32.partialorder %v1572_v58, %v634_v43  ;;  %vm659_vm4 = vcmp.le.f32.partialorder %v1577_v13, %v634_v43 }
 0x124   : > { %vm684_vm5 = vcmp.lt.s32.totalorder %v681_v52, %v672_v2  ;;  %vm686_vm6 = vcmp.lt.s32.totalorder %v683_v53, %v674_v20  ;;  %v661_v54 = vsel %vm645_vm11, %v1581_v27, 64  ;;  %v663_v55 = vsel %vm647_vm12, %v1584_v33, 64 }
 0x125   : > { %v685_v56 = vsel %vm684_vm5, %v681_v52, %v672_v2  ;;  %v687_v57 = vsel %vm686_vm6, %v683_v53, %v674_v20  ;;  %v665_v59 = vsel %vm649_vm13, %v1587_v37, 64  ;;  %v667_v60 = vsel %vm651_vm14, %v1590_v38, 64 }
 0x126   : > { %vm688_vm7 = vcmp.lt.s32.totalorder %v685_v56, %v687_v57  ;;  %v669_v4 = vsel %vm653_vm1, %v1593_v39, 64  ;;  %vm699_vm8 = vcmp.lt.s32.totalorder %v661_v54, %v665_v59  ;;  %vm701_vm9 = vcmp.lt.s32.totalorder %v663_v55, %v667_v60 }
 0x127   : > { %v689_v61 = vsel %vm688_vm7, %v685_v56, %v687_v57  ;;  %v671_v62 = vsel %vm655_vm2, %v1596_v40, 64  ;;  %v700_v1 = vsel %vm699_vm8, %v661_v54, %v665_v59  ;;  %v702_v11 = vsel %vm701_vm9, %v663_v55, %v667_v60 }
 0x128   : > { %v690_v22 = vrot.slane %v689_v61, 4  ;;  %v673_v24 = vsel %vm657_vm3, %v1599_v41, 64  ;;  %vm703_vm10 = vcmp.lt.s32.totalorder %v700_v1, %v669_v4  ;;  %vm705_vm11 = vcmp.lt.s32.totalorder %v702_v11, %v671_v62 }
 0x129   : > { %v675_v34 = vsel %vm659_vm4, %v1602_v42, 64  ;;  %v704_v3 = vsel %vm703_vm10, %v700_v1, %v669_v4  ;;  %v706_v5 = vsel %vm705_vm11, %v702_v11, %v671_v62  ;;  %v1373_v43 = vmov 1.0|1.0  }
 0x12a   : > { %vm691_vm12 = vcmp.lt.s32.totalorder %v689_v61, %v690_v22  ;;  %vm707_vm13 = vcmp.lt.s32.totalorder %v704_v3, %v673_v24  ;;  %vm709_vm14 = vcmp.lt.s32.totalorder %v706_v5, %v675_v34 }
 0x12b   : > { %v692_v9 = vsel %vm691_vm12, %v689_v61, %v690_v22  ;;  %v708_v12 = vsel %vm707_vm13, %v704_v3, %v673_v24  ;;  %v710_v14 = vsel %vm709_vm14, %v706_v5, %v675_v34  ;;  %vm907_vm13 = vcmp.lt.s32.totalorder %v635_v21, 256  ;;  %v786_v21 = vpop.trf.xlu0 }
 0x12c   : > { %v693_v47 = vrot.slane %v692_v9, 2  ;;  %vm711_vm15 = vcmp.lt.s32.totalorder %v708_v12, %v710_v14 }
 0x12d   : > { %v712_v15 = vsel %vm711_vm15, %v708_v12, %v710_v14 }
 0x12e   : > { %vm694_vm0 = vcmp.lt.s32.totalorder %v692_v9, %v693_v47  ;;  %v713_v16 = vrot.slane %v712_v15, 4 }
 0x12f   : > { %v695_v58 = vsel %vm694_vm0, %v692_v9, %v693_v47 }
 0x130   : > { %v696_v17 = vrot.slane %v695_v58, 1  ;;  %vm714_vm1 = vcmp.lt.s32.totalorder %v712_v15, %v713_v16 }
 0x131   : > { %v715_v13 = vsel %vm714_vm1, %v712_v15, %v713_v16 }
 0x132   : > { %v716_v44 = vrot.slane %v715_v13, 2  ;;  %vm697_vm2 = vcmp.lt.s32.totalorder %v695_v58, %v696_v17 }
 0x133   : > { %v698_v45 = vsel %vm697_vm2, %v695_v58, %v696_v17 }
 0x134   : > { %vm717_vm3 = vcmp.lt.s32.totalorder %v715_v13, %v716_v44  ;;  %vm722_vm5 = vcmp.eq.s32.totalorder %v1581_v27, %v698_v45  ;;  %vm724_vm6 = vcmp.eq.s32.totalorder %v1584_v33, %v698_v45  ;;  %vm726_vm15 = vcmp.eq.s32.totalorder %v1587_v37, %v698_v45 }
 0x135   : > { %v718_v26 = vsel %vm717_vm3, %v715_v13, %v716_v44  ;;  %vm1284_vm12 = vmpackc.low %vm724_vm6, %vm722_vm5  ;;  %vm728_vm0 = vcmp.eq.s32.totalorder %v1590_v38, %v698_v45  ;;  %vm730_vm5 = vcmp.eq.s32.totalorder %v1593_v39, %v698_v45  ;;  %vm732_vm6 = vcmp.eq.s32.totalorder %v1596_v40, %v698_v45 }
 0x136   : > { %v719_v28 = vrot.slane %v718_v26, 1  ;;  %vm1288_vm3 = vmpackc.low %vm728_vm0, %vm726_vm15  ;;  %vm1003_vm15 = vcmask 516096   ;;  %vm931_vm0 = vcmask 0  }
 0x138   : > { %vm720_vm4 = vcmp.lt.s32.totalorder %v718_v26, %v719_v28 }
 0x139   : > { %v721_v31 = vsel %vm720_vm4, %v718_v26, %v719_v28 }
 0x13a   : > { %v890_v35 = vcombine.low %v698_v45, %v721_v31  ;;  %vm723_vm7 = vcmp.eq.s32.totalorder %v1581_v27, %v721_v31  ;;  %vm725_vm8 = vcmp.eq.s32.totalorder %v1584_v33, %v721_v31  ;;  %vm727_vm9 = vcmp.eq.s32.totalorder %v1587_v37, %v721_v31  ;;  %v787_v33 = vpop.trf.xlu0 }
 0x13b   : > { %vm1282_vm10 = vmpackc.low %vm725_vm8, %vm723_vm7  ;;  %vm729_vm11 = vcmp.eq.s32.totalorder %v1590_v38, %v721_v31  ;;  %vm731_vm1 = vcmp.eq.s32.totalorder %v1593_v39, %v721_v31  ;;  %vm733_vm2 = vcmp.eq.s32.totalorder %v1596_v40, %v721_v31  ;;  %vm735_vm7 = vcmp.eq.s32.totalorder %v1599_v41, %v721_v31 }
 0x13c   : > { %v897_v36 = vrot.slane %v890_v35, %v896_v29  ;;  %1283 = vmatprep.subr.msk.bf16.mxu1 %vm1282_vm10, %v1373_v43  ;;  %1299 = vmatprep.subr.msk.bf16.mxu0 %vm1282_vm10, %v1373_v43  ;;  %vm1286_vm14 = vmpackc.low %vm729_vm11, %vm727_vm9  ;;  %vm737_vm8 = vcmp.eq.s32.totalorder %v1602_v42, %v721_v31  ;;  %vm734_vm11 = vcmp.eq.s32.totalorder %v1599_v41, %v698_v45 }
 0x13d   : > { %1285 = vmatpush1.bf16.msk.msra.mxu1 %vm1284_vm12, %v1373_v43  ;;  %1301 = vmatpush1.bf16.xpose.msk.msra.mxu0 %vm1284_vm12, %v1373_v43  ;;  %vm1290_vm4 = vmpackc.low %vm733_vm2, %vm731_vm1  ;;  %vm736_vm12 = vcmp.eq.s32.totalorder %v1602_v42, %v698_v45 }
 0x13e   : > { %v904_v27 = vrot.slane %v897_v36, %v896_v29  ;;  %1287 = vmatprep.subr.msk.bf16.mxu1 %vm1286_vm14, %v1373_v43  ;;  %1303 = vmatprep.subr.msk.bf16.mxu0 %vm1286_vm14, %v1373_v43  ;;  %vm1292_vm9 = vmpackc.low %vm732_vm6, %vm730_vm5  ;;  %vm802_vm14 = vcmask 523264  }
 0x13f   : > { %vm1294_vm10 = vmpackc.low %vm737_vm8, %vm735_vm7 }
 0x140   : > { %909 = vst.msk [vmem:[%s331_s25] sm:$0x3] %vm907_vm13, %v904_v27  ;;  %vm1296_vm13 = vmpackc.low %vm736_vm12, %vm734_vm11 }
 0x141   : > { %1289 = vmatpush1.bf16.msk.msra.mxu1 %vm1288_vm3, %v1373_v43 }
 0x142   : > { %1291 = vmatprep.subr.msk.bf16.mxu1 %vm1290_vm4, %v1373_v43 }
 0x145   : > { %1293 = vmatpush1.bf16.msk.msra.mxu1 %vm1292_vm9, %v1373_v43  ;;  %1305 = vmatpush1.bf16.xpose.msk.msra.mxu0 %vm1288_vm3, %v1373_v43 }
 0x146   : > { %1295 = vmatprep.subr.msk.bf16.mxu1 %vm1294_vm10, %v1373_v43  ;;  %1307 = vmatprep.subr.msk.bf16.mxu0 %vm1290_vm4, %v1373_v43 }
 0x149   : > { %1297 = vmatpush1.bf16.msk.msra.mxu1 %vm1296_vm13, %v1373_v43 }
 0x14c   : > { %1256 = vmatmul.mubr.msk.f32.vlgmr.msra.gmra.mrb[0].mxu1 %vm802_vm14, %v786_v21 }
 0x14d   : > { %1309 = vmatpush1.bf16.xpose.msk.msra.mxu0 %vm1292_vm9, %v1373_v43  ;;  %879 = vmatprep.mubr.f32.mxu1 %v1369_v0 }
 0x14e   : > { %1311 = vmatprep.subr.msk.bf16.mxu0 %vm1294_vm10, %v1373_v43 }
 0x150   : > { %1257 = vmatmul.mubr.msk.f32.gmra.mrb[2].mxu1 %vm802_vm14, %v787_v33 }
 0x155   : > { %1313 = vmatpush1.bf16.xpose.msk.msra.mxu0 %vm1296_vm13, %v1373_v43 }
 0x15c   : > { %998 = vmatmul.mubr.f32.vlgmr.msra.gmra.mrb[16].mxu0 %v1371_v30 }
 0x21f   : > { %v875_v37 = vpop.f32.mrb[0].mxu1 }
 0x220   : > { %886 = vst [vmem:[%s322_s28] sm:$0xff] %v875_v37  ;;  %v910_v38 = vsub.f32 %v875_v37, %v1453_v8  ;;  %v877_v39 = vpop.f32.mrb[1].mxu1 }
 0x221   : > { %887 = vst [vmem:[%s322_s28 + $0x8] sm:$0xff] %v877_v39  ;;  %v911_v40 = vsub.f32 %v877_v39, %v1449_v6 }
 0x222   : > { %v914_v0 = vmul.f32 %v910_v38, %v910_v38 }
 0x223   : > { %v915_v41 = vmul.f32 %v911_v40, %v911_v40  ;;  %v881_v42 = vpop.f32.mrb[2].mxu1 }
 0x224   : > { %888 = vst [vmem:[%s322_s28 + $0x10] sm:$0xff] %v881_v42  ;;  %v912_v30 = vsub.f32 %v881_v42, %v1457_v10  ;;  %v883_v48 = vpop.f32.mrb[3].mxu1 }
 0x225   : > { %889 = vst [vmem:[%s322_s28 + $0x18] sm:$0xff] %v883_v48  ;;  %v913_v49 = vsub.f32 %v883_v48, %v1451_v7  ;;  %v918_v50 = vadd.f32 %v915_v41, %v914_v0 }
 0x226   : > { %v916_v51 = vmul.f32 %v912_v30, %v912_v30 }
 0x227   : > { %v917_v63 = vmul.f32 %v913_v49, %v913_v49  ;;  %919 = vadd.xlane.f32.xlu1 %v918_v50 }
 0x229   : > { %v921_v8 = vadd.f32 %v917_v63, %v916_v51 }
 0x22b   : > { %922 = vadd.xlane.f32.xlu1 %v921_v8 }
 0x22f   : > { %v999_v6 = vpop.f32.mrb[16].mxu0 }
 0x230   : > { %1004 = vst.msk [vmem:[%s344_s7] sm:$0x1] %vm1003_vm15, %v999_v6  ;;  %v1001_v19 = vpop.f32.mrb[17].mxu0 }
 0x2b4   : > { %v920_v10 = vpop.xlane.xlu1 %919 }
 0x2b8   : > { %v923_v2 = vpop.xlane.xlu1 %922 }
 0x2b9   : > { %v924_v20 = vadd.f32 %v923_v2, %v920_v10 }
 0x2bb   : > { %v925_v32 = vrot.slane %v924_v20, 4 }
 0x2bd   : > { %v926_v7 = vadd.f32 %v925_v32, %v924_v20 }
 0x2bf   : > { %v927_v46 = vrot.slane %v926_v7, 2 }
 0x2c1   : > { %v928_v52 = vadd.f32 %v927_v46, %v926_v7 }
 0x2c3   : > { %v929_v53 = vrot.slane %v928_v52, 1 }
 0x2c5   : > { %v930_v54 = vadd.f32 %v929_v53, %v928_v52 }
 0x2c7   : > { %932 = vst.msk [vmem:[%s338_s10] sm:$0x1] %vm931_vm0, %v930_v54 }
 0x2c8 PF: > { %s17_s23 = sadd.s32 1, %s1367_s23   ;;  %s1706_s21 = smov %s1363_s22 }
 0x2c9   : > { %p14_p5 = scmp.ge.s32.totalorder %s17_s23, 4   ;;  %s1707_s22 = smov %s1709_s24 }
 0x2cb   :  { %16 = sbr.rel (!%p14_p5) target bundleno = 2 (0x2), region = 98 }

</bundles_post_ra>
